<compile_context>
chip_gen: v7x
topology: tpu7x:2x2x1
jax: 0.10.0
libtpu: 0.0.40
codegen_flags: <defaults>
</compile_context>

<pallas_src>
import functools

import jax
import jax.numpy as jnp
from jax import lax
from jax.experimental import pallas as pl
from jax.experimental.pallas import tpu as pltpu


def _smooth_grad_kernel(x_ref, wmask_ref, out_ref, carry_ref, *, H, W, TD, penalty):
    """One (bc, d-block) grid step.

    x_ref:     (1, TD, H*W) input tile, native dtype.
    wmask_ref: (1, H*W) f32; 1.0 where the +1 lane neighbour is in the same W-row, else 0.0.
    out_ref:   (1, 8, 128) f32 per-bc accumulator (resident across the d-block axis).
               Sublane 0 -> D-diff sum, 1 -> H-diff sum, 2 -> W-diff sum (read lane 0 in JAX).
    carry_ref: (1, H*W) f32 scratch holding the last D-row of the previous tile.
    """
    HW = H * W
    db = pl.program_id(1)

    cur = x_ref[0].astype(jnp.float32)            # (TD, HW), cast in-kernel (bf16 DMA stays bf16)

    @pl.when(db == 0)
    def _init():
        out_ref[...] = jnp.zeros_like(out_ref)
        carry_ref[...] = cur[0:1, :]              # makes the boundary D-diff exactly 0 at db == 0

    def pen(d):
        return jnp.abs(d) if penalty == "l1" else d * d

    # ---- D-diff: row (sublane-major) shift inside the tile + carry across tile boundary ----
    if TD > 1:
        s_d = jnp.sum(pen(cur[1:, :] - cur[:-1, :]))
    else:
        s_d = jnp.float32(0.0)
    s_d = s_d + jnp.sum(pen(cur[0:1, :] - carry_ref[...]))
    carry_ref[...] = cur[TD - 1:TD, :]            # carry for the next d-block of this bc

    # ---- H-diff: lane shift by W inside the flattened H*W axis (every pair is valid) ----
    if H > 1:
        s_h = jnp.sum(pen(cur[:, W:] - cur[:, :-W]))
    else:
        s_h = jnp.float32(0.0)

    # ---- W-diff: lane shift by 1, masked so pairs never straddle a W-row boundary ----
    if HW > 1:
        dw = cur[:, 1:] - cur[:, :-1]             # (TD, HW-1)
        s_w = jnp.sum(pen(dw) * wmask_ref[:, : HW - 1])
    else:
        s_w = jnp.float32(0.0)

    # ---- accumulate the 3 per-tile partial sums into sublane rows 0/1/2 of the output ----
    sub = lax.broadcasted_iota(jnp.int32, (1, 8, 128), 1)
    upd = (jnp.where(sub == 0, s_d, 0.0)
           + jnp.where(sub == 1, s_h, 0.0)
           + jnp.where(sub == 2, s_w, 0.0))
    out_ref[...] += upd


def smooth_grad_loss(f, penalty="l1", tile_budget_bytes=1 << 20):
    """Pallas implementation of SmoothGradLoss.forward for 5-D f [B, C, D, H, W]."""
    assert penalty in ("l1", "l2")
    assert f.ndim == 5
    B, C, D, H, W = f.shape
    BC, HW = B * C, H * W

    x = f.reshape(BC, D, HW)                      # free reshape; NO f32 upcast in the glue

    # W-boundary mask (tiny, ~HW*4 bytes), built once on host.
    col = jnp.arange(HW, dtype=jnp.int32)
    wmask = ((col % W) != (W - 1)).astype(jnp.float32).reshape(1, HW)

    # Tile the D axis: largest divisor of D whose tile fits the per-buffer VMEM budget.
    itemsize = jnp.dtype(f.dtype).itemsize
    max_td = max(1, tile_budget_bytes // max(1, HW * itemsize))
    td = 1
    for cand in range(1, D + 1):
        if D % cand == 0 and cand <= max_td:
            td = cand
    ndb = D // td

    n_total = B * C * D * H * W
    cost = pl.CostEstimate(
        flops=9 * n_total,
        transcendentals=0,
        bytes_accessed=n_total * itemsize + BC * 8 * 128 * 4 + HW * 4,
    )

    out = pl.pallas_call(
        functools.partial(_smooth_grad_kernel, H=H, W=W, TD=td, penalty=penalty),
        out_shape=jax.ShapeDtypeStruct((BC, 8, 128), jnp.float32),
        grid_spec=pltpu.PrefetchScalarGridSpec(
            num_scalar_prefetch=0,
            grid=(BC, ndb),
            in_specs=[
                pl.BlockSpec((1, td, HW), lambda bc, db: (bc, db, 0)),
                pl.BlockSpec((1, HW), lambda bc, db: (0, 0)),
            ],
            out_specs=pl.BlockSpec((1, 8, 128), lambda bc, db: (bc, 0, 0)),
            scratch_shapes=[pltpu.VMEM((1, HW), jnp.float32)],
        ),
        compiler_params=pltpu.CompilerParams(
            dimension_semantics=("parallel", "arbitrary"),
            vmem_limit_bytes=32 * 1024 * 1024,
        ),
        cost_estimate=cost,
    )(x, wmask)

    s_d = jnp.sum(out[:, 0, 0])
    s_h = jnp.sum(out[:, 1, 0])
    s_w = jnp.sum(out[:, 2, 0])

    # Per-dim means (== torch.mean over each full diff tensor), then mean of the three.
    # TODO(synk): a spatial dim of size 1 gives mean-of-empty = NaN, matching the torch module.
    n_d = BC * (D - 1) * HW
    n_h = BC * D * (H - 1) * W
    n_w = BC * D * H * (W - 1)
    return (s_d / n_d + s_h / n_h + s_w / n_w) / jnp.float32(3.0)


def _reference(f, penalty="l1"):
    g = f.astype(jnp.float32)
    means = []
    for ax in (2, 3, 4):
        d = jnp.diff(g, axis=ax)
        means.append(jnp.mean(jnp.abs(d)) if penalty == "l1" else jnp.mean(d * d))
    return jnp.mean(jnp.stack(means))


if __name__ == "__main__":
    key = jax.random.PRNGKey(0)
    f32 = jax.random.normal(key, (2, 4, 8, 16, 16), dtype=jnp.float32)  # [B, C, D, H, W]

    for penalty in ("l1", "l2"):
        ref = jax.block_until_ready(_reference(f32, penalty))

        out = jax.block_until_ready(smooth_grad_loss(f32, penalty))
        if not jnp.allclose(out, ref, rtol=1e-5, atol=1e-5):
            raise AssertionError(f"mismatch ({penalty}, single D tile): {out} vs {ref}")

        # Force D to be split into multiple tiles -> exercises the carry across tile boundaries.
        out_t = jax.block_until_ready(
            smooth_grad_loss(f32, penalty, tile_budget_bytes=2 * 16 * 16 * 4))
        if not jnp.allclose(out_t, ref, rtol=1e-5, atol=1e-5):
            raise AssertionError(f"mismatch ({penalty}, tiled D): {out_t} vs {ref}")

    # Native bf16 input: DMA'd as bf16 (half the HBM traffic), cast to f32 inside the kernel.
    fbf16 = f32.astype(jnp.bfloat16)
    out_bf = jax.block_until_ready(smooth_grad_loss(fbf16, "l1"))
    ref_bf = jax.block_until_ready(_reference(fbf16, "l1"))
    if not jnp.allclose(out_bf, ref_bf, rtol=1e-3, atol=1e-3):
        raise AssertionError(f"mismatch (bf16): {out_bf} vs {ref_bf}")

    print("KERNEL_OK")
</pallas_src>

<mosaic_0001>
module attributes {stable_mosaic.version = 11 : i64} {
  func.func @_smooth_grad_kernel(%arg0: i32, %arg1: i32, %arg2: memref<1x8x256xf32, #tpu.memory_space<vmem>>, %arg3: memref<1x256xf32, #tpu.memory_space<vmem>>, %arg4: memref<1x8x128xf32, #tpu.memory_space<vmem>>, %arg5: memref<1x256xf32, #tpu.memory_space<vmem>>) attributes {dimension_semantics = [#tpu.dimension_semantics<parallel>, #tpu.dimension_semantics<arbitrary>], iteration_bounds = array<i64: 8, 1>, scalar_prefetch = 0 : i64, scratch_operands = 1 : i64, tpu.core_type = #tpu.core_type<tc>, window_params = [{transform_indices = @transform_0, window_bounds = array<i64: 1, 8, 256>}, {pipeline_mode = #tpu.pipeline_mode<synchronous>, transform_indices = @transform_1, window_bounds = array<i64: 1, 256>}, {transform_indices = @transform_2, window_bounds = array<i64: 1, 8, 128>}]} {
    %c0 = arith.constant 0 : index
    %c0_0 = arith.constant 0 : index
    %c0_1 = arith.constant 0 : index
    %0 = vector.load %arg2[%c0, %c0_0, %c0_1] : memref<1x8x256xf32, #tpu.memory_space<vmem>>, vector<1x8x256xf32>
    %1 = vector.shape_cast %0 : vector<1x8x256xf32> to vector<8x256xf32>
    %c0_i32 = arith.constant 0 : i32
    %2 = arith.cmpi eq, %arg1, %c0_i32 : i32
    %3 = arith.extui %2 : i1 to i32
    %c0_i32_2 = arith.constant 0 : i32
    %4 = arith.cmpi ne, %3, %c0_i32_2 : i32
    scf.if %4 {
      %cst_22 = arith.constant 0.000000e+00 : f32
      %64 = vector.broadcast %cst_22 : f32 to vector<1x8x128xf32>
      %c0_23 = arith.constant 0 : index
      %c0_24 = arith.constant 0 : index
      %c0_25 = arith.constant 0 : index
      %65 = vector.load %arg4[%c0_23, %c0_24, %c0_25] : memref<1x8x128xf32, #tpu.memory_space<vmem>>, vector<1x8x128xf32>
      tpu.vector_store %arg4[%c0_23, %c0_24, %c0_25], %64 {strides = array<i32>} : memref<1x8x128xf32, #tpu.memory_space<vmem>>, vector<1x8x128xf32>,
      %66 = vector.extract_strided_slice %1 {offsets = [0, 0], sizes = [1, 256], strides = [1, 1]} : vector<8x256xf32> to vector<1x256xf32>
      %c0_26 = arith.constant 0 : index
      %c0_27 = arith.constant 0 : index
      %67 = vector.load %arg5[%c0_26, %c0_27] : memref<1x256xf32, #tpu.memory_space<vmem>>, vector<1x256xf32>
      tpu.vector_store %arg5[%c0_26, %c0_27], %66 {strides = array<i32>} : memref<1x256xf32, #tpu.memory_space<vmem>>, vector<1x256xf32>,
    } else {
    }
    %5 = vector.extract_strided_slice %1 {offsets = [1, 0], sizes = [7, 256], strides = [1, 1]} : vector<8x256xf32> to vector<7x256xf32>
    %6 = vector.extract_strided_slice %1 {offsets = [0, 0], sizes = [7, 256], strides = [1, 1]} : vector<8x256xf32> to vector<7x256xf32>
    %7 = arith.subf %5, %6 : vector<7x256xf32>
    %8 = math.absf %7 : vector<7x256xf32>
    %9 = vector.shape_cast %8 : vector<7x256xf32> to vector<1x7x256xf32>
    %cst = arith.constant dense<0.000000e+00> : vector<1xf32>
    %10 = vector.multi_reduction <add>, %9, %cst [1, 2] : vector<1x7x256xf32> to vector<1xf32>
    %11 = vector.shape_cast %10 : vector<1xf32> to vector<1x1x1xf32>
    %12 = vector.extract %11[0, 0, 0] : f32 from vector<1x1x1xf32>
    %13 = vector.extract_strided_slice %1 {offsets = [0, 0], sizes = [1, 256], strides = [1, 1]} : vector<8x256xf32> to vector<1x256xf32>
    %c0_3 = arith.constant 0 : index
    %c0_4 = arith.constant 0 : index
    %14 = vector.load %arg5[%c0_3, %c0_4] : memref<1x256xf32, #tpu.memory_space<vmem>>, vector<1x256xf32>
    %15 = arith.subf %13, %14 : vector<1x256xf32>
    %16 = math.absf %15 : vector<1x256xf32>
    %17 = vector.shape_cast %16 : vector<1x256xf32> to vector<1x1x256xf32>
    %cst_5 = arith.constant dense<0.000000e+00> : vector<1xf32>
    %18 = vector.multi_reduction <add>, %17, %cst_5 [1, 2] : vector<1x1x256xf32> to vector<1xf32>
    %19 = vector.shape_cast %18 : vector<1xf32> to vector<1x1x1xf32>
    %20 = vector.extract %19[0, 0, 0] : f32 from vector<1x1x1xf32>
    %21 = arith.addf %12, %20 : f32
    %22 = vector.extract_strided_slice %1 {offsets = [7, 0], sizes = [1, 256], strides = [1, 1]} : vector<8x256xf32> to vector<1x256xf32>
    %c0_6 = arith.constant 0 : index
    %c0_7 = arith.constant 0 : index
    %23 = vector.load %arg5[%c0_6, %c0_7] : memref<1x256xf32, #tpu.memory_space<vmem>>, vector<1x256xf32>
    tpu.vector_store %arg5[%c0_6, %c0_7], %22 {strides = array<i32>} : memref<1x256xf32, #tpu.memory_space<vmem>>, vector<1x256xf32>,
    %24 = vector.extract_strided_slice %1 {offsets = [0, 16], sizes = [8, 240], strides = [1, 1]} : vector<8x256xf32> to vector<8x240xf32>
    %25 = vector.extract_strided_slice %1 {offsets = [0, 0], sizes = [8, 240], strides = [1, 1]} : vector<8x256xf32> to vector<8x240xf32>
    %26 = arith.subf %24, %25 : vector<8x240xf32>
    %27 = math.absf %26 : vector<8x240xf32>
    %28 = vector.shape_cast %27 : vector<8x240xf32> to vector<1x8x240xf32>
    %cst_8 = arith.constant dense<0.000000e+00> : vector<1xf32>
    %29 = vector.multi_reduction <add>, %28, %cst_8 [1, 2] : vector<1x8x240xf32> to vector<1xf32>
    %30 = vector.shape_cast %29 : vector<1xf32> to vector<1x1x1xf32>
    %31 = vector.extract %30[0, 0, 0] : f32 from vector<1x1x1xf32>
    %32 = vector.extract_strided_slice %1 {offsets = [0, 1], sizes = [8, 255], strides = [1, 1]} : vector<8x256xf32> to vector<8x255xf32>
    %33 = vector.extract_strided_slice %1 {offsets = [0, 0], sizes = [8, 255], strides = [1, 1]} : vector<8x256xf32> to vector<8x255xf32>
    %34 = arith.subf %32, %33 : vector<8x255xf32>
    %35 = math.absf %34 : vector<8x255xf32>
    %c0_9 = arith.constant 0 : index
    %c0_10 = arith.constant 0 : index
    %36 = vector.load %arg3[%c0_9, %c0_10] : memref<1x256xf32, #tpu.memory_space<vmem>>, vector<1x255xf32>
    %37 = vector.broadcast %36 : vector<1x255xf32> to vector<8x255xf32>
    %38 = arith.mulf %35, %37 : vector<8x255xf32>
    %39 = vector.shape_cast %38 : vector<8x255xf32> to vector<1x8x255xf32>
    %cst_11 = arith.constant dense<0.000000e+00> : vector<1xf32>
    %40 = vector.multi_reduction <add>, %39, %cst_11 [1, 2] : vector<1x8x255xf32> to vector<1xf32>
    %41 = vector.shape_cast %40 : vector<1xf32> to vector<1x1x1xf32>
    %42 = vector.extract %41[0, 0, 0] : f32 from vector<1x1x1xf32>
    %43 = tpu.iota {dimensions = array<i32: 1>} : vector<1x8x128xi32>
    %c0_i32_12 = arith.constant 0 : i32
    %44 = vector.broadcast %c0_i32_12 : i32 to vector<1x8x128xi32>
    %45 = arith.cmpi eq, %43, %44 : vector<1x8x128xi32>
    %cst_13 = arith.constant 0.000000e+00 : f32
    %46 = vector.broadcast %21 : f32 to vector<1x8x128xf32>
    %47 = vector.broadcast %cst_13 : f32 to vector<1x8x128xf32>
    %48 = arith.select %45, %46, %47 : vector<1x8x128xi1>, vector<1x8x128xf32>
    %c1_i32 = arith.constant 1 : i32
    %49 = vector.broadcast %c1_i32 : i32 to vector<1x8x128xi32>
    %50 = arith.cmpi eq, %43, %49 : vector<1x8x128xi32>
    %cst_14 = arith.constant 0.000000e+00 : f32
    %51 = vector.broadcast %31 : f32 to vector<1x8x128xf32>
    %52 = vector.broadcast %cst_14 : f32 to vector<1x8x128xf32>
    %53 = arith.select %50, %51, %52 : vector<1x8x128xi1>, vector<1x8x128xf32>
    %54 = arith.addf %48, %53 : vector<1x8x128xf32>
    %c2_i32 = arith.constant 2 : i32
    %55 = vector.broadcast %c2_i32 : i32 to vector<1x8x128xi32>
    %56 = arith.cmpi eq, %43, %55 : vector<1x8x128xi32>
    %cst_15 = arith.constant 0.000000e+00 : f32
    %57 = vector.broadcast %42 : f32 to vector<1x8x128xf32>
    %58 = vector.broadcast %cst_15 : f32 to vector<1x8x128xf32>
    %59 = arith.select %56, %57, %58 : vector<1x8x128xi1>, vector<1x8x128xf32>
    %60 = arith.addf %54, %59 : vector<1x8x128xf32>
    %c0_16 = arith.constant 0 : index
    %c0_17 = arith.constant 0 : index
    %c0_18 = arith.constant 0 : index
    %61 = vector.load %arg4[%c0_16, %c0_17, %c0_18] : memref<1x8x128xf32, #tpu.memory_space<vmem>>, vector<1x8x128xf32>
    %62 = arith.addf %61, %60 : vector<1x8x128xf32>
    %c0_19 = arith.constant 0 : index
    %c0_20 = arith.constant 0 : index
    %c0_21 = arith.constant 0 : index
    %63 = vector.load %arg4[%c0_19, %c0_20, %c0_21] : memref<1x8x128xf32, #tpu.memory_space<vmem>>, vector<1x8x128xf32>
    tpu.vector_store %arg4[%c0_19, %c0_20, %c0_21], %62 {strides = array<i32>} : memref<1x8x128xf32, #tpu.memory_space<vmem>>, vector<1x8x128xf32>,
    return
  }
  func.func @transform_0(%arg0: i32, %arg1: i32) -> (i32, i32, i32) {
    %c0_i32 = arith.constant 0 : i32
    %c0_i32_0 = arith.constant 0 : i32
    return %arg0, %arg1, %c0_i32 : i32, i32, i32
  }
  func.func @transform_1(%arg0: i32, %arg1: i32) -> (i32, i32) {
    %c0_i32 = arith.constant 0 : i32
    %c0_i32_0 = arith.constant 0 : i32
    %c0_i32_1 = arith.constant 0 : i32
    return %c0_i32, %c0_i32_0 : i32, i32
  }
  func.func @transform_2(%arg0: i32, %arg1: i32) -> (i32, i32, i32) {
    %c0_i32 = arith.constant 0 : i32
    %c0_i32_0 = arith.constant 0 : i32
    %c0_i32_1 = arith.constant 0 : i32
    return %arg0, %c0_i32, %c0_i32_0 : i32, i32, i32
  }
}

</mosaic_0001>

<bundles_post_ra>
// kernel: tpu_custom_call.1
= control target key start
LH: loop header
LB: loop body
LE: loop exit
PB: predicated region body
PF: predicated region fallthrough
CT: control target
= control target key end

     0   :  { %7 = vsyncpa [#allocation4], 0  ;;  %s918_s0 = inlined_call_operand.hbm [shape: f32[8,8,256], index: 0, kind: input, shape index: {}]   ;;  %s919_s1 = inlined_call_operand.vmem [shape: f32[1,256], index: 1, kind: input, shape index: {}]   ;;  %s920_s2 = inlined_call_operand.hbm [shape: f32[8,8,128], index: 2, kind: output, shape index: {}]  }
   0x1   :  { %9 = vsyncpa [#allocation4 + $0x1], 0 }
   0x2   :  { %10 = vsyncpa [#allocation5], 0 }
   0x3   :  { %12 = vsyncpa [#allocation5 + $0x1], 0  ;;  %s712_s9 = smov 0   ;;  %s714_s10 = smov 0  }
   0x4   :  { %s716_s11 = smov 0   ;;  %s718_s12 = smov 0  }
   0x5   :  { %s720_s13 = smov 0   ;;  %s722_s14 = smov 0  }
   0x6 LB: > { %s484_s15 = sadd.s32 4294967295, %s688_s14   ;;  %s485_s16 = sadd.s32 4294967294, %s688_s14   ;;  %s688_s14 = sphi %s722_s14, %s18_s14   ;;  %s684_s13 = sphi %s720_s13, %s935_s13   ;;  %s680_s12 = sphi %s718_s12, %s934_s12   ;;  %s676_s11 = sphi %s716_s11, %s933_s11   ;;  %s672_s10 = sphi %s714_s10, %s932_s10   ;;  %s668_s9 = sphi %s712_s9, %s931_s9  }
   0x7   : > { %s30_s17 = sadd.s32 1, %s684_s13  ;;  %s39_s18 = sadd.s32 1, %s676_s11 }
   0x8   : > { %p32_p0 = scmp.ge.s32.totalorder %s30_s17, 8  ;;  %p46_p1 = scmp.ne.s32.totalorder %s676_s11, %s672_s10 }
   0x9   : > { %p47_p2 = scmp.eq.s32.totalorder %s688_s14, 0  ;;  %p52_p3 = scmp.ne.s32.totalorder %s672_s10, %s668_s9 }
   0xa   : > { %s937_s17 = smov (%p32_p0, %s30_s17), 0  ;;  %p53_p5 = scmp.eq.s32.totalorder %s484_s15, 0 }
   0xb   : > { %p753_p4 = por %p47_p2, %p46_p1  ;;  %s34_s20 = ssub.s32 %s684_s13, %s937_s17 }
   0xc   : > { %p97_p6 = scmp.eq.s32.totalorder %s484_s15, 7  ;;  %p37_p7 = scmp.eq.s32.totalorder %s34_s20, 0 }
   0xd   : > { %p759_p8 = por %p53_p5, %p52_p3  ;;  %p103_p10 = scmp.eq.s32.totalorder %s485_s16, 7 }
   0xe   : > { %p763_p9 = por %p97_p6, %p46_p1  ;;  %p519_p12 = scmp.lt.s32.totalorder %s688_s14, 8 }
   0xf   : > { %s768_s23 = scalar_select %p37_p7, %s676_s11, %s39_s18  }
  0x10   : > { %s924_s22 = scalar_select %p763_p9, 1, 0 }
  0x11   : > { %p770_p11 = por %p103_p10, %p52_p3  ;;  %s126_s25 = sand.u32 1, %s676_s11  }
  0x12   : > { %s488_s26 = sshll.u32 %s126_s25, 4  ;;  %s498_s27 = sshll.u32 %s684_s13, 8 }
  0x13   : > { %s925_s24 = scalar_select %p770_p11, 1, 0 }
  0x14   : > { %s780_s30 = scalar_lea.hbm %s918_s0, %s498_s27  ;;  %s130_s3 = scalar_lea.vmem [#allocation3], %s488_s26 }
  0x15   : > { %s140_s4 = sshll.u32 %s130_s3, 4  ;;  %p786_p13 = pnand %p519_p12, %p753_p4  ;;  %s782_s4 = int_to_ptr.vmem [resolvable:$true] %s140_s4 }
  0x16   : > { %s127_s6 = scalar_lea.sflag [#allocation4], %s126_s25  ;;  %s576_s7 = scalar_lea.hbm %s780_s30, 256 }
  0x17   : > { %p577_p2 = scmp.ne.s32.totalorder %s780_s30, %s576_s7  ;;  %p578_p3 = pneg %p786_p13 }
  0x18   : > { %s581_s16 = scalar_lea.hbm %s918_s0, 2048  ;;  %p582_p4 = scmp.lt.u32.totalorder %s780_s30, %s918_s0 }
  0x19   : > { %p579_p5 = pnand %p578_p3, %p577_p2  ;;  %p583_p7 = scmp.lt.u32.totalorder %s581_s16, %s576_s7 }
  0x1a   : > { %p585_p12 = scmp.lt.u32.totalorder %s576_s7, %s780_s30 }
  0x1b   : > { %p580_p6 = pneg %p579_p5  ;;  %p584_p10 = por %p583_p7, %p582_p4 }
  0x1d   : > { %p586_p0 = por %p585_p12, %p584_p10 }
  0x1f   : > { %p587_p1 = pnand %p586_p0, %p580_p6 }
  0x21   : > { %590 = shalt.err (!%p587_p1)
}
  0x22   : > { %s591_s20 = scalar_lea.vmem %s782_s4, 256  ;;  %s690_s25 = smov [#allocation3]  }
  0x23   : > { %p592_p2 = scmp.ne.s32.totalorder %s782_s4, %s591_s20  ;;  %s596_s26 = sshll.u32 %s690_s25, 4  ;;  %s597_s26 = int_to_ptr.vmem [resolvable:$false] %s596_s26 }
  0x24   : > { %s598_s27 = scalar_lea.vmem %s597_s26, 512  ;;  %p599_p9 = scmp.lt.s32.totalorder %s782_s4, %s597_s26 }
  0x25   : > { %p594_p5 = pnand %p592_p2, %p578_p3  ;;  %p600_p4 = scmp.lt.s32.totalorder %s598_s27, %s591_s20 }
  0x27   : > { %p595_p11 = pneg %p594_p5  ;;  %p601_p7 = por %p600_p4, %p599_p9 }
  0x29   : > { %p602_p10 = pnand %p601_p7, %p595_p11 }
  0x2b   : > { %605 = shalt.err (!%p602_p10)
}
  0x2c   : > { %514 = dma.hbm_to_vmem [thread:$0]  (!%p786_p13), %s780_s30, 256, %s782_s4, %s127_s6  }
  0x2d   : > { %p927_p0 = scmp.lt.s32.totalorder %s688_s14, 9  ;;  %p928_p1 = scmp.ge.s32.totalorder %s688_s14, 1 }
  0x2f   : > { %p146_p3 = pnand %p928_p1, %p927_p0 }
  0x30   : > { %s822_s28 = sand.u32 (!%p146_p3), 1, %s672_s10  }
  0x31   : > { %149 = sbr.rel (%p146_p3) target bundleno = 526 (0x20e), region = 28  ;;  %s492_s29 = sshll.u32 (!%p146_p3), %s822_s28, 4 }
  0x32   : > { %s152_s3 = scalar_lea.sflag (!%p146_p3), [#allocation4], %s822_s28  ;;  %s155_s7 = scalar_lea.vmem (!%p146_p3), [#allocation3], %s492_s29 }
  0x38   : > { %659 = dma.done.wait (%p759_p8), %s152_s3, 256  }
  0x39   : > { %661 = vsyncadd (%p759_p8), %s152_s3, 4294967040  ;;  %v189_v0 = vlaneseq  ;;  %v832_v2 = vld [vmem:[%s155_s7] sm:$0xff]  ;;  %s691_s30 = smov 1   ;;  %s692_s4 = smov 16   ;;  %v838_v5 = vld [vmem:[%s155_s7 + $0x8] sm:$0xff]  ;;  %vm251_vm1 = vcmask 1040384  }
  0x3a   : > { %321 = vrot.lane.b32.xlu1 %v832_v2, %s691_s30  ;;  %288 = vrot.lane.b32.xlu0 %v832_v2, %s692_s4  ;;  %v333_v6 = vld [vmem:[%s919_s1] sm:$0x3]  ;;  %v693_v9 = vmov 1966171168   ;;  %v185_v11 = vcombine.low %v832_v2, %v838_v5  ;;  %v265_v13 = vcombine.high %v832_v2, %v838_v5  ;;  %vm325_vm2 = vcmask 7168   ;;  %s694_s6 = smov 112  }
  0x3b   : > { %v830_v1 = vshrl.u32 %v189_v0, 7  ;;  %v187_v10 = vunpack.c.l.s4 %v693_v9  ;;  %vm203_vm0 = vcmp.lt.s32.totalorder %v189_v0, 256  ;;  %vm292_vm3 = vcmask 130048   ;;  %s695_s8 = smov 127   ;;  %s493_s20 = sshll.u32 %s822_s28, 3 }
  0x3c   : > { %v208_v50 = vrot.slane %v832_v2, 7  ;;  %v209_v51 = vrot.slane %v838_v5, 7  ;;  %vm222_vm4 = vcmask 1046528   ;;  %vm306_vm5 = vcmask 916480   ;;  %s495_s26 = sshll.u32 %s680_s12, 7  ;;  %s175_s27 = scalar_lea.vmem [#allocation6], %s493_s20 }
  0x3d   : > { %v243_v3 = vsub.s32 1, %v830_v1  ;;  %v239_v4 = vsub.s32 0, %v830_v1  ;;  %v188_v12 = vunpack.c.0.s8 %v187_v10  ;;  %vm358_vm6 = vcmask 1039360   ;;  %s403_s29 = sshll.u32 %s175_s27, 4  ;;  %p929_p9 = scmp.ne.s32.totalorder %s924_s22, 0  ;;  %s872_s29 = int_to_ptr.vmem [resolvable:$true] %s403_s29 }
  0x3e   : > { %323 = vrot.lane.b32.xlu1 %v838_v5, %s691_s30  ;;  %290 = vrot.lane.b32.xlu0 %v838_v5, %s692_s4  ;;  %v212_v52 = vsub.f32 %v832_v2, %v208_v50  ;;  %v213_v53 = vsub.f32 %v838_v5, %v209_v51  ;;  %vm378_vm7 = vcmp.eq.s32.totalorder %v830_v1, 1  ;;  %vm375_vm8 = vcmp.eq.s32.totalorder %v830_v1, 0  ;;  %s390_s4 = scalar_lea.sflag [#allocation5], %s822_s28  ;;  %s606_s5 = scalar_lea.vmem %s872_s29, 128 }
  0x3f   : > { %v342_v7 = vrot.slane %v333_v6, %v243_v3  ;;  %v338_v8 = vrot.slane %v333_v6, %v239_v4  ;;  %v191_v14 = vsub.s32 %v188_v12, %v830_v1  ;;  %vm382_vm9 = vcmp.eq.s32.totalorder %v830_v1, 2  ;;  %p607_p8 = scmp.ne.s32.totalorder %s872_s29, %s606_s5  ;;  %s696_s12 = smov [#allocation6]  }
  0x40   : > { %v214_v54 = vand.u32 2147483647, %v212_v52  ;;  %v215_v55 = vand.u32 2147483647, %v213_v53  ;;  %s610_s21 = sshll.u32 %s696_s12, 4  ;;  %s611_s21 = int_to_ptr.vmem [resolvable:$false] %s610_s21 }
  0x41   : > { %v192_v15 = vrot.slane %v185_v11, %v191_v14  ;;  %v272_v16 = vrot.slane %v265_v13, %v191_v14  ;;  %p608_p11 = pnand %p607_p8, %p929_p9  ;;  %p613_p6 = scmp.lt.s32.totalorder %s872_s29, %s611_s21 }
  0x42   : > { %345 = vrot.lane.b32.xlu1 %v342_v7, %s691_s30  ;;  %343 = vrot.lane.b32.xlu0 %v338_v8, %s691_s30  ;;  %v218_v56 = vrot.slane %v214_v54, 1  ;;  %v219_v57 = vrot.slane %v215_v55, 1  ;;  %s870_s30 = scalar_lea.hbm %s920_s2, %s495_s26 }
  0x43   : > { %v199_v17 = vrot.slane %v192_v15, %v191_v14  ;;  %v273_v18 = vcombine.high %v272_v16, %v272_v16  ;;  %p609_p13 = pneg %p608_p11 }
  0x44   : > { %v223_v58 = vsel %vm222_vm4, %v218_v56, 0.0  ;;  %v224_v59 = vsel %vm222_vm4, %v219_v57, 0.0 }
  0x45   : > { %205 = vst.msk [vmem:[#allocation2] sm:$0x3] %vm203_vm0, %v199_v17  ;;  %v280_v19 = vrot.slane %v273_v18, %v191_v14  ;;  %v225_v60 = vadd.f32 %v224_v59, %v223_v58 }
  0x47   : > { %v281_v20 = vcombine.high %v280_v19, %v280_v19 }
  0x4c   : > { %v235_v21 = vld [vmem:[#allocation2] sm:$0x3] }
  0x4d   : > { %v240_v22 = vrot.slane %v235_v21, %v239_v4  ;;  %v244_v23 = vrot.slane %v235_v21, %v243_v3  ;;  %287 = vst.msk [vmem:[#allocation2] sm:$0x3] %vm203_vm0, %v281_v20 }
  0x4f   : > { %v247_v24 = vsub.f32 %v832_v2, %v240_v22  ;;  %v248_v25 = vsub.f32 %v838_v5, %v244_v23 }
  0x51   : > { %v249_v26 = vand.u32 2147483647, %v247_v24  ;;  %v250_v27 = vand.u32 2147483647, %v248_v25 }
  0x53   : > { %v252_v28 = vsel %vm251_vm1, %v249_v26, 0.0  ;;  %v253_v29 = vsel %vm251_vm1, %v250_v27, 0.0 }
  0x54   : > { %v254_v30 = vadd.f32 %v253_v29, %v252_v28 }
  0xac   : > { %v322_v31 = vpop.permute.xlu1 %321  ;;  %v289_v32 = vpop.permute.xlu0 %288 }
  0xad   : > { %v296_v33 = vsub.f32 %v832_v2, %v289_v32  ;;  %v329_v34 = vsub.f32 %v832_v2, %v322_v31 }
  0xaf   : > { %v298_v35 = vand.u32 2147483647, %v296_v33  ;;  %v331_v42 = vand.u32 2147483647, %v329_v34 }
  0xb0   : > { %v324_v36 = vpop.permute.xlu1 %323  ;;  %v291_v37 = vpop.permute.xlu0 %290 }
  0xb1   : > { %v326_v38 = vsel %vm325_vm2, %v322_v31, %v324_v36  ;;  %v293_v39 = vsel %vm292_vm3, %v289_v32, %v291_v37  ;;  %302 = vrot.lane.b32.xlu0 %v298_v35, %s694_s6 }
  0xb2   : > { %v330_v40 = vsub.f32 %v838_v5, %v326_v38  ;;  %v297_v41 = vsub.f32 %v838_v5, %v293_v39 }
  0xb4   : > { %v332_v43 = vand.u32 2147483647, %v330_v40  ;;  %v299_v44 = vand.u32 2147483647, %v297_v41  ;;  %v346_v45 = vpop.permute.xlu1 %345  ;;  %v344_v46 = vpop.permute.xlu0 %343 }
  0xb5   : > { %v347_v47 = vsel %vm325_vm2, %v344_v46, %v346_v45  ;;  %v350_v48 = vmul.f32 %v344_v46, %v331_v42 }
  0xb6   : > { %304 = vrot.lane.b32.xlu1 %v299_v44, %s694_s6  ;;  %v351_v49 = vmul.f32 %v347_v47, %v332_v43  ;;  %s612_s6 = scalar_lea.vmem %s611_s21, 256 }
  0xb7   : > { %354 = vrot.lane.b32.xlu0 %v350_v48, %s695_s8  ;;  %p614_p12 = scmp.lt.s32.totalorder %s612_s6, %s606_s5 }
  0xb9   : > { %p615_p2 = por %p614_p12, %p613_p6 }
  0xba   : > { %356 = vrot.lane.b32.xlu1 %v351_v49, %s695_s8 }
  0xbb   : > { %p616_p5 = pnand %p615_p2, %p609_p13 }
  0xd6   : > { %226 = vadd.xlane.f32.xlu0 %v225_v60 }
  0xde   : > { %255 = vadd.xlane.f32.xlu1 %v254_v30 }
 0x123   : > { %v303_v61 = vpop.permute.xlu0 %302 }
 0x128   : > { %v305_v62 = vpop.permute.xlu1 %304 }
 0x129   : > { %v307_v63 = vsel %vm306_vm5, %v303_v61, %v305_v62  ;;  %v310_v0 = vsel %vm306_vm5, %v305_v62, 0.0  ;;  %v355_v2 = vpop.permute.xlu0 %354 }
 0x12a   : > { %v311_v3 = vadd.f32 %v310_v0, %v307_v63 }
 0x12c   : > { %v357_v4 = vpop.permute.xlu1 %356  ;;  %312 = vadd.xlane.f32.xlu0 %v311_v3 }
 0x12d   : > { %v359_v5 = vsel %vm358_vm6, %v355_v2, %v357_v4  ;;  %v362_v6 = vsel %vm358_vm6, %v357_v4, 0.0 }
 0x12e   : > { %v363_v7 = vadd.f32 %v362_v6, %v359_v5 }
 0x130   : > { %364 = vadd.xlane.f32.xlu0 %v363_v7 }
 0x163   : > { %v227_v8 = vpop.xlane.xlu0 %226 }
 0x164   : > { %v228_v9 = vrot.slane %v227_v8, 4 }
 0x166   : > { %v229_v10 = vadd.f32 %v228_v9, %v227_v8 }
 0x168   : > { %v230_v11 = vrot.slane %v229_v10, 2 }
 0x16a   : > { %v231_v12 = vadd.f32 %v230_v11, %v229_v10 }
 0x16b   : > { %v256_v13 = vpop.xlane.xlu1 %255 }
 0x16c   : > { %v257_v14 = vrot.slane %v256_v13, 4  ;;  %v232_v15 = vrot.slane %v231_v12, 1 }
 0x16e   : > { %v258_v16 = vadd.f32 %v257_v14, %v256_v13  ;;  %v233_v17 = vadd.f32 %v232_v15, %v231_v12 }
 0x170   : > { %v259_v18 = vrot.slane %v258_v16, 2  ;;  %499 = vpush %v233_v17 }
 0x172   : > { %v260_v19 = vadd.f32 %v259_v18, %v258_v16 }
 0x174   : > { %v261_v20 = vrot.slane %v260_v19, 1 }
 0x176   : > { %v262_v21 = vadd.f32 %v261_v20, %v260_v19 }
 0x178   : > { %501 = vpush %v262_v21 }
 0x1a1   : > { %s500_s15 = spop %499 }
 0x1a9   : > { %s502_s16 = spop %501 }
 0x1aa   : > { %s264_s18 = sadd.f32 %s502_s16, %s500_s15 }
 0x1ac   : > { %v376_v36 = vstv %s264_s18 }
 0x1ad   : > { %v377_v39 = vsel %vm375_vm8, %v376_v36, 0.0 }
 0x1b9   : > { %v313_v22 = vpop.xlane.xlu0 %312 }
 0x1ba   : > { %v314_v23 = vrot.slane %v313_v22, 4 }
 0x1bc   : > { %v315_v24 = vadd.f32 %v314_v23, %v313_v22 }
 0x1bd   : > { %v365_v25 = vpop.xlane.xlu0 %364 }
 0x1be   : > { %v316_v26 = vrot.slane %v315_v24, 2  ;;  %v366_v27 = vrot.slane %v365_v25, 4 }
 0x1c0   : > { %v367_v28 = vadd.f32 %v366_v27, %v365_v25  ;;  %v317_v29 = vadd.f32 %v316_v26, %v315_v24 }
 0x1c2   : > { %v368_v30 = vrot.slane %v367_v28, 2  ;;  %v318_v31 = vrot.slane %v317_v29, 1 }
 0x1c4   : > { %v369_v32 = vadd.f32 %v368_v30, %v367_v28  ;;  %v319_v33 = vadd.f32 %v318_v31, %v317_v29 }
 0x1c6   : > { %503 = vpush %v319_v33  ;;  %v370_v34 = vrot.slane %v369_v32, 1 }
 0x1c8   : > { %v371_v35 = vadd.f32 %v370_v34, %v369_v32 }
 0x1ca   : > { %505 = vpush %v371_v35 }
 0x1f7   : > { %s504_s19 = spop %503 }
 0x1f8   : > { %v379_v37 = vstv %s504_s19 }
 0x1f9   : > { %v380_v38 = vsel %vm378_vm7, %v379_v37, 0.0 }
 0x1fa   : > { %v381_v40 = vadd.f32 %v380_v38, %v377_v39 }
 0x1fb   : > { %s506_s25 = spop %505 }
 0x1fc   : > { %v383_v41 = vstv %s506_s25 }
 0x1fd   : > { %v384_v42 = vsel %vm382_vm9, %v383_v41, 0.0 }
 0x1fe   : > { %v385_v43 = vadd.f32 %v384_v42, %v381_v40 }
 0x200   : > { %388 = vst [vmem:[%s175_s27] sm:$0xff] %v385_v43 }
 0x201   : > { %619 = shalt.err (!%p616_p5)
}
 0x202   : > { %s620_s28 = scalar_lea.hbm %s870_s30, 128  ;;  %s624_s16 = scalar_lea.hbm %s920_s2, 1024 }
 0x203   : > { %p621_p4 = scmp.ne.s32.totalorder %s870_s30, %s620_s28  ;;  %p625_p0 = scmp.lt.u32.totalorder %s870_s30, %s920_s2 }
 0x204   : > { %p626_p1 = scmp.lt.u32.totalorder %s624_s16, %s620_s28  ;;  %p628_p8 = scmp.lt.u32.totalorder %s620_s28, %s870_s30 }
 0x205   : > { %p622_p7 = pnand %p621_p4, %p929_p9 }
 0x206   : > { %p627_p3 = por %p626_p1, %p625_p0 }
 0x207   : > { %p623_p10 = pneg %p622_p7 }
 0x208   : > { %p629_p11 = por %p628_p8, %p627_p3 }
 0x20a   : > { %p630_p13 = pnand %p629_p11, %p623_p10 }
 0x20c   : > { %633 = shalt.err (!%p630_p13)
}
 0x20d   : > { %509 = dma.vmem_to_hbm [thread:$0]  (%p929_p9), %s872_s29, 128, %s870_s30, %s390_s4  }
 0x20e PF: > { %p520_p6 = scmp.ge.s32.totalorder %s688_s14, 2  ;;  %s415_s20 = sand.u32 1, %s668_s9  }
 0x20f   : > { %p930_p12 = scmp.ne.s32.totalorder %s925_s24, 0  ;;  %s416_s25 = scalar_lea.sflag [#allocation5], %s415_s20 }
 0x211   : > { %p516_p2 = pnand %p520_p6, %p930_p12 }
 0x213   : > { %663 = dma.done.wait (!%p516_p2), %s416_s25, 128  }
 0x214   : > { %665 = vsyncadd (!%p516_p2), %s416_s25, 4294967168  ;;  %s18_s14 = sadd.s32 1, %s688_s14   ;;  %s931_s9 = smov %s672_s10 }
 0x215   : > { %p15_p5 = scmp.ge.s32.totalorder %s18_s14, 10   ;;  %s932_s10 = smov %s676_s11 }
 0x216   : > { %s933_s11 = smov %s768_s23  ;;  %s934_s12 = smov %s684_s13 }
 0x217   : > { %s935_s13 = smov %s937_s17  ;;  %17 = sbr.rel (!%p15_p5) target bundleno = 6 (0x6), region = 77 }
 0x21e   :  { %421 = vsyncpa [#allocation4], 1 }
 0x21f   :  { %423 = vsyncpa [#allocation4 + $0x1], 1 }
 0x220   :  { %424 = vsyncpa [#allocation5], 1 }
 0x221   :  { %426 = vsyncpa [#allocation5 + $0x1], 1 }

</bundles_post_ra>
